<compile_context>
chip_gen: v5e
topology: v5e:2x2
jax: 0.10.0
libtpu: 0.0.40
codegen_flags: <defaults>
</compile_context>

<pallas_src>
import jax
import jax.numpy as jnp
from jax.experimental import pallas as pl
from jax.experimental.pallas import tpu as pltpu


_CHUNK = 1024  # lanes per in-kernel chunk (multiple of 128)


def _mlp_kernel(x_ref, w1_ref, b1_ref, w2_ref, b2_ref, w3t_ref, b3_ref, o_ref):
    """Whole 3-layer MLP for one lane-dense batch tile, fused in one body."""
    w1 = w1_ref[...]    # (20, 2)
    b1 = b1_ref[...]    # (20, 1)
    w2 = w2_ref[...]    # (20, 20)
    b2 = b2_ref[...]    # (20, 1)
    w3t = w3t_ref[...]  # (20, 1)  (W3 transposed in the wrapper)
    b3 = b3_ref[...]    # (1, 1)

    tile_b = x_ref.shape[-1]
    chunk = min(_CHUNK, tile_b)
    n_chunks = tile_b // chunk

    # Static (unrolled) chunk loop: static 128-aligned slices, keeps the
    # (20, chunk) intermediates near the vreg file instead of streaming full
    # (20, tile_b) slabs through VMEM.
    for c in range(n_chunks):
        lo = c * chunk
        x = x_ref[:, lo:lo + chunk]                                  # (2, C)
        # Layer 1 (K=2): two broadcast-FMAs on the VPU instead of a
        # zero-padded MXU pass.
        h1 = w1[:, 0:1] * x[0:1, :] + w1[:, 1:2] * x[1:2, :] + b1    # (20, C)
        h1 = jnp.maximum(h1, 0.0)
        # Layer 2 (20x20): the only real matmul -> MXU.
        h2 = jnp.dot(w2, h1, preferred_element_type=jnp.float32) + b2
        h2 = jnp.maximum(h2, 0.0)                                    # (20, C)
        # Layer 3 (M=1): 20-row sublane reduction on the VPU/XLU.
        y = jnp.sum(w3t * h2, axis=0, keepdims=True) + b3            # (1, C)
        o_ref[:, lo:lo + chunk] = y.astype(o_ref.dtype)


def _round_up(n, m):
    return ((n + m - 1) // m) * m


def _choose_tile_b(B, max_tile_b):
    # >=2 grid steps when the batch allows it (v7x has 2 TensorCores and
    # "parallel" only shards work if there are >=2 steps), capped so the
    # per-tile VMEM footprint stays at a few MiB on every generation.
    tile = _round_up(max(pl.cdiv(B, 2), 1), _CHUNK)
    return max(_CHUNK, min(max_tile_b, tile))


def vdp_mlp_forward_feature_major(x2b, params, *, tile_b=None, max_tile_b=16384):
    """Fast path.  x2b: (2, B) float32 -> (1, B) float32."""
    w1, b1, w2, b2, w3, b3 = params
    B = x2b.shape[1]

    if tile_b is None:
        tile_b = _choose_tile_b(B, max_tile_b)
    tile_b = max(_CHUNK, _round_up(tile_b, _CHUNK))

    num_tiles = pl.cdiv(B, tile_b)
    Bp = num_tiles * tile_b
    if Bp != B:
        # NOTE: padded lanes carry bias garbage through the ReLUs; they are
        # sliced off below and must never be consumed directly.
        x2b = jnp.pad(x2b, ((0, 0), (0, Bp - B)))

    full = lambda i: (0, 0)  # constant block index -> params fetched once

    param_bytes = sum(int(p.size) * 4 for p in params)
    cost = pl.CostEstimate(
        flops=2 * Bp * (2 * 20 + 20 * 20 + 20 * 1),
        transcendentals=0,
        bytes_accessed=Bp * 2 * 4 + Bp * 4 + param_bytes,
    )

    out = pl.pallas_call(
        _mlp_kernel,
        out_shape=jax.ShapeDtypeStruct((1, Bp), jnp.float32),
        grid_spec=pltpu.PrefetchScalarGridSpec(
            num_scalar_prefetch=0,
            grid=(num_tiles,),
            in_specs=[
                pl.BlockSpec((2, tile_b), lambda i: (0, i)),   # x (lane-dense)
                pl.BlockSpec((20, 2), full),                   # W1
                pl.BlockSpec((20, 1), full),                   # b1
                pl.BlockSpec((20, 20), full),                  # W2
                pl.BlockSpec((20, 1), full),                   # b2
                pl.BlockSpec((20, 1), full),                   # W3^T
                pl.BlockSpec((1, 1), full),                    # b3
            ],
            # Lane-dense output slab: unmasked vst + contiguous HBM writeback.
            out_specs=pl.BlockSpec((1, tile_b), lambda i: (0, i)),
        ),
        compiler_params=pltpu.CompilerParams(
            # Batch-tile axis shards across TensorCores on v7x megacore.
            dimension_semantics=("parallel",),
        ),
        cost_estimate=cost,
    )(x2b, w1, b1, w2, b2, w3.T, b3)

    return out[:, :B] if Bp != B else out


def vdp_mlp_forward(x, params, **kw):
    """PyTorch-layout convenience wrapper: (B, 2) -> (B, 1).

    The transpose/pad here costs more HBM traffic than the kernel; for hot
    loops keep activations feature-major and call the fast path directly."""
    y = vdp_mlp_forward_feature_major(x.T, params, **kw)
    return y.T


def init_params(key):
    """Deterministic init mimicking PyTorch nn.Linear default:
    U(-1/sqrt(fan_in), 1/sqrt(fan_in)) for weight and bias.
    Weights are (out_features, in_features) (PyTorch-native), biases (out, 1)."""
    def linear(k, fan_in, fan_out):
        kw, kb = jax.random.split(k)
        bound = 1.0 / jnp.sqrt(jnp.float32(fan_in))
        w = jax.random.uniform(kw, (fan_out, fan_in), jnp.float32, -bound, bound)
        b = jax.random.uniform(kb, (fan_out, 1), jnp.float32, -bound, bound)
        return w, b

    k1, k2, k3 = jax.random.split(key, 3)
    w1, b1 = linear(k1, 2, 20)
    w2, b2 = linear(k2, 20, 20)
    w3, b3 = linear(k3, 20, 1)
    return (w1, b1, w2, b2, w3, b3)


def reference_forward(x, params):
    w1, b1, w2, b2, w3, b3 = params
    h1 = jnp.maximum(x @ w1.T + b1.T, 0.0)
    h2 = jnp.maximum(h1 @ w2.T + b2.T, 0.0)
    return h2 @ w3.T + b3.T


if __name__ == "__main__":
    key = jax.random.PRNGKey(0)
    kp, kx = jax.random.split(key)
    params = init_params(kp)

    # Small batch of (x, y) Van der Pol states: single padded tile, one chunk.
    x_small = jax.random.normal(kx, (8, 2), jnp.float32)
    out_small = jax.block_until_ready(vdp_mlp_forward(x_small, params))
    ref_small = reference_forward(x_small, params)
    assert out_small.shape == (8, 1)
    assert jnp.allclose(out_small, ref_small, atol=1e-4, rtol=1e-4), \
        "mismatch vs JAX reference (small batch)"

    # Larger, non-multiple batch in the native feature-major layout:
    # multi-tile grid (>=2 "parallel" steps for v7x), padded tail, multi-chunk.
    x_big = jax.random.normal(kx, (5000, 2), jnp.float32)
    out_fm = jax.block_until_ready(
        vdp_mlp_forward_feature_major(x_big.T, params))
    ref_big = reference_forward(x_big, params)
    assert out_fm.shape == (1, 5000)
    assert jnp.allclose(out_fm.T, ref_big, atol=1e-4, rtol=1e-4), \
        "mismatch vs JAX reference (large batch, feature-major path)"

    print("KERNEL_OK")
</pallas_src>

<mosaic_0001>
module attributes {stable_mosaic.version = 11 : i64} {
  func.func @_mlp_kernel(%arg0: i32, %arg1: memref<2x1024xf32, #tpu.memory_space<vmem>>, %arg2: memref<20x2xf32, #tpu.memory_space<vmem>>, %arg3: memref<20x1xf32, #tpu.memory_space<vmem>>, %arg4: memref<20x20xf32, #tpu.memory_space<vmem>>, %arg5: memref<20x1xf32, #tpu.memory_space<vmem>>, %arg6: memref<20x1xf32, #tpu.memory_space<vmem>>, %arg7: memref<1x1xf32, #tpu.memory_space<vmem>>, %arg8: memref<1x1024xf32, #tpu.memory_space<vmem>>) attributes {dimension_semantics = [#tpu.dimension_semantics<parallel>], iteration_bounds = array<i64: 1>, scalar_prefetch = 0 : i64, scratch_operands = 0 : i64, tpu.core_type = #tpu.core_type<tc>, window_params = [{transform_indices = @transform_0, window_bounds = array<i64: 2, 1024>}, {pipeline_mode = #tpu.pipeline_mode<synchronous>, transform_indices = @transform_1, window_bounds = array<i64: 20, 2>}, {pipeline_mode = #tpu.pipeline_mode<synchronous>, transform_indices = @transform_2, window_bounds = array<i64: 20, 1>}, {pipeline_mode = #tpu.pipeline_mode<synchronous>, transform_indices = @transform_3, window_bounds = array<i64: 20, 20>}, {pipeline_mode = #tpu.pipeline_mode<synchronous>, transform_indices = @transform_4, window_bounds = array<i64: 20, 1>}, {pipeline_mode = #tpu.pipeline_mode<synchronous>, transform_indices = @transform_5, window_bounds = array<i64: 20, 1>}, {pipeline_mode = #tpu.pipeline_mode<synchronous>, transform_indices = @transform_6, window_bounds = array<i64: 1, 1>}, {transform_indices = @transform_7, window_bounds = array<i64: 1, 1024>}]} {
    %c0 = arith.constant 0 : index
    %c0_0 = arith.constant 0 : index
    %0 = vector.load %arg2[%c0, %c0_0] : memref<20x2xf32, #tpu.memory_space<vmem>>, vector<20x2xf32>
    %c0_1 = arith.constant 0 : index
    %c0_2 = arith.constant 0 : index
    %1 = vector.load %arg3[%c0_1, %c0_2] : memref<20x1xf32, #tpu.memory_space<vmem>>, vector<20x1xf32>
    %c0_3 = arith.constant 0 : index
    %c0_4 = arith.constant 0 : index
    %2 = vector.load %arg4[%c0_3, %c0_4] : memref<20x20xf32, #tpu.memory_space<vmem>>, vector<20x20xf32>
    %c0_5 = arith.constant 0 : index
    %c0_6 = arith.constant 0 : index
    %3 = vector.load %arg5[%c0_5, %c0_6] : memref<20x1xf32, #tpu.memory_space<vmem>>, vector<20x1xf32>
    %c0_7 = arith.constant 0 : index
    %c0_8 = arith.constant 0 : index
    %4 = vector.load %arg6[%c0_7, %c0_8] : memref<20x1xf32, #tpu.memory_space<vmem>>, vector<20x1xf32>
    %c0_9 = arith.constant 0 : index
    %c0_10 = arith.constant 0 : index
    %5 = vector.load %arg7[%c0_9, %c0_10] : memref<1x1xf32, #tpu.memory_space<vmem>>, vector<1x1xf32>
    %c0_11 = arith.constant 0 : index
    %c0_12 = arith.constant 0 : index
    %6 = vector.load %arg1[%c0_11, %c0_12] : memref<2x1024xf32, #tpu.memory_space<vmem>>, vector<2x1024xf32>
    %7 = vector.extract_strided_slice %0 {offsets = [0, 0], sizes = [20, 1], strides = [1, 1]} : vector<20x2xf32> to vector<20x1xf32>
    %8 = vector.extract_strided_slice %6 {offsets = [0, 0], sizes = [1, 1024], strides = [1, 1]} : vector<2x1024xf32> to vector<1x1024xf32>
    %9 = vector.broadcast %7 : vector<20x1xf32> to vector<20x1024xf32>
    %10 = vector.broadcast %8 : vector<1x1024xf32> to vector<20x1024xf32>
    %11 = arith.mulf %9, %10 : vector<20x1024xf32>
    %12 = vector.extract_strided_slice %0 {offsets = [0, 1], sizes = [20, 1], strides = [1, 1]} : vector<20x2xf32> to vector<20x1xf32>
    %13 = vector.extract_strided_slice %6 {offsets = [1, 0], sizes = [1, 1024], strides = [1, 1]} : vector<2x1024xf32> to vector<1x1024xf32>
    %14 = vector.broadcast %12 : vector<20x1xf32> to vector<20x1024xf32>
    %15 = vector.broadcast %13 : vector<1x1024xf32> to vector<20x1024xf32>
    %16 = arith.mulf %14, %15 : vector<20x1024xf32>
    %17 = arith.addf %11, %16 : vector<20x1024xf32>
    %18 = vector.broadcast %1 : vector<20x1xf32> to vector<20x1024xf32>
    %19 = arith.addf %17, %18 : vector<20x1024xf32>
    %cst = arith.constant 0.000000e+00 : f32
    %20 = vector.broadcast %cst : f32 to vector<20x1024xf32>
    %21 = arith.maximumf %19, %20 : vector<20x1024xf32>
    %cst_13 = arith.constant dense<0.000000e+00> : vector<20x1024xf32>
    %22 = tpu.matmul %2, %21, %cst_13 {dimension_numbers = #tpu.dot_dimension_numbers<[1], [0], [0], [1], [0, 0, 1, 1], [], []>} : vector<20x20xf32>, vector<20x1024xf32>, vector<20x1024xf32> -> vector<20x1024xf32>
    %23 = vector.broadcast %3 : vector<20x1xf32> to vector<20x1024xf32>
    %24 = arith.addf %22, %23 : vector<20x1024xf32>
    %cst_14 = arith.constant 0.000000e+00 : f32
    %25 = vector.broadcast %cst_14 : f32 to vector<20x1024xf32>
    %26 = arith.maximumf %24, %25 : vector<20x1024xf32>
    %27 = vector.broadcast %4 : vector<20x1xf32> to vector<20x1024xf32>
    %28 = arith.mulf %27, %26 : vector<20x1024xf32>
    %cst_15 = arith.constant dense<0.000000e+00> : vector<1024xf32>
    %29 = vector.multi_reduction <add>, %28, %cst_15 [0] : vector<20x1024xf32> to vector<1024xf32>
    %30 = vector.shape_cast %29 : vector<1024xf32> to vector<1x1024xf32>
    %31 = vector.broadcast %5 : vector<1x1xf32> to vector<1x1024xf32>
    %32 = arith.addf %30, %31 : vector<1x1024xf32>
    %c0_16 = arith.constant 0 : index
    %c0_17 = arith.constant 0 : index
    %33 = vector.load %arg8[%c0_16, %c0_17] : memref<1x1024xf32, #tpu.memory_space<vmem>>, vector<1x1024xf32>
    tpu.vector_store %arg8[%c0_16, %c0_17], %32 {strides = array<i32>} : memref<1x1024xf32, #tpu.memory_space<vmem>>, vector<1x1024xf32>,
    return
  }
  func.func @transform_0(%arg0: i32) -> (i32, i32) {
    %c0_i32 = arith.constant 0 : i32
    %c0_i32_0 = arith.constant 0 : i32
    return %c0_i32, %arg0 : i32, i32
  }
  func.func @transform_1(%arg0: i32) -> (i32, i32) {
    %c0_i32 = arith.constant 0 : i32
    %c0_i32_0 = arith.constant 0 : i32
    %c0_i32_1 = arith.constant 0 : i32
    return %c0_i32, %c0_i32_0 : i32, i32
  }
  func.func @transform_2(%arg0: i32) -> (i32, i32) {
    %c0_i32 = arith.constant 0 : i32
    %c0_i32_0 = arith.constant 0 : i32
    %c0_i32_1 = arith.constant 0 : i32
    return %c0_i32, %c0_i32_0 : i32, i32
  }
  func.func @transform_3(%arg0: i32) -> (i32, i32) {
    %c0_i32 = arith.constant 0 : i32
    %c0_i32_0 = arith.constant 0 : i32
    %c0_i32_1 = arith.constant 0 : i32
    return %c0_i32, %c0_i32_0 : i32, i32
  }
  func.func @transform_4(%arg0: i32) -> (i32, i32) {
    %c0_i32 = arith.constant 0 : i32
    %c0_i32_0 = arith.constant 0 : i32
    %c0_i32_1 = arith.constant 0 : i32
    return %c0_i32, %c0_i32_0 : i32, i32
  }
  func.func @transform_5(%arg0: i32) -> (i32, i32) {
    %c0_i32 = arith.constant 0 : i32
    %c0_i32_0 = arith.constant 0 : i32
    %c0_i32_1 = arith.constant 0 : i32
    return %c0_i32, %c0_i32_0 : i32, i32
  }
  func.func @transform_6(%arg0: i32) -> (i32, i32) {
    %c0_i32 = arith.constant 0 : i32
    %c0_i32_0 = arith.constant 0 : i32
    %c0_i32_1 = arith.constant 0 : i32
    return %c0_i32, %c0_i32_0 : i32, i32
  }
  func.func @transform_7(%arg0: i32) -> (i32, i32) {
    %c0_i32 = arith.constant 0 : i32
    %c0_i32_0 = arith.constant 0 : i32
    return %c0_i32, %arg0 : i32, i32
  }
}

</mosaic_0001>

<bundles_post_ra>
// kernel: tpu_custom_call.1
= control target key start
LH: loop header
LB: loop body
LE: loop exit
PB: predicated region body
PF: predicated region fallthrough
CT: control target
= control target key end

     0   :  { %s1080_s0 = inlined_call_operand.vmem [shape: f32[2,1024], index: 0, kind: input, shape index: {}]   ;;  %s1081_s1 = inlined_call_operand.vmem [shape: f32[20,2], index: 1, kind: input, shape index: {}]   ;;  %s1082_s2 = inlined_call_operand.vmem [shape: f32[20,1], index: 2, kind: input, shape index: {}]   ;;  %s1083_s3 = inlined_call_operand.vmem [shape: f32[20,20], index: 3, kind: input, shape index: {}]   ;;  %s1084_s4 = inlined_call_operand.vmem [shape: f32[20,1], index: 4, kind: input, shape index: {}]   ;;  %s1085_s5 = inlined_call_operand.vmem [shape: f32[20,1], index: 5, kind: input, shape index: {}]   ;;  %s1086_s6 = inlined_call_operand.<no memory space> [shape: f32[1,1], index: 6, kind: input, shape index: {}]   ;;  %s1087_s7 = inlined_call_operand.hbm [shape: f32[1,1024], index: 7, kind: output, shape index: {}]  }
   0x1   :  { %v12_v0 = vstv %s1086_s6 }
   0x2   :  { %13 = vst [vmem:[#allocation2] sm:$0x1] %v12_v0 }
   0x3   :  { %v31_v1 = vld [vmem:[%s1081_s1 + $0x10] sm:$0xf]  ;;  %v30_v2 = vld [vmem:[%s1081_s1 + $0x8] sm:$0xff]  ;;  %v781_v3 = vmov 1   ;;  %v782_v4 = vmov 0   ;;  %v29_v5 = vld [vmem:[%s1081_s1] sm:$0xff] }
   0x4   :  { %747 = vset.pattern.permute.xlu0 %v781_v3  ;;  %749 = vset.pattern.permute.xlu1 %v782_v4 }
   0x5   :  { %121 = vperm.xlu0 %747, %v31_v1   ;;  %54 = vperm.xlu1 %749, %v30_v2  }
   0x6   :  { %751 = vset.pattern.permute.xlu2 %v782_v4 }
   0x7   :  { %14 = vsyncpa [#allocation4], 0  ;;  %49 = vperm.xlu2 %751, %v29_v5   ;;  %v32_v6 = vld [vmem:[%s1082_s2] sm:$0xff]  ;;  %v34_v7 = vld [vmem:[%s1082_s2 + $0x10] sm:$0xf]  ;;  %vm284_vm0 = vcmask 1043456  }
   0x8   :  { %v33_v8 = vld [vmem:[%s1082_s2 + $0x8] sm:$0xff]  ;;  %v38_v10 = vld [vmem:[%s1084_s4] sm:$0xff]  ;;  %v40_v12 = vld [vmem:[%s1084_s4 + $0x10] sm:$0xf]  ;;  %vm274_vm1 = vcmask 162816   ;;  %vm681_vm2 = vcmask 1040384  }
   0x9   :  { %v42_v9 = vld [vmem:[%s1085_s5 + $0x8] sm:$0xff]  ;;  %v41_v13 = vld [vmem:[%s1085_s5] sm:$0xff]  ;;  %v43_v14 = vld [vmem:[%s1085_s5 + $0x10] sm:$0xf]  ;;  %vm683_vm3 = vcmask 1042434   ;;  %vm685_vm4 = vcmask 1041408  }
   0xa   :  { %v39_v11 = vld [vmem:[%s1084_s4 + $0x8] sm:$0xff]  ;;  %v44_v15 = vld [vmem:[#allocation2] sm:$0x1]  ;;  %vm687_vm5 = vcmask 1044484   ;;  %vm689_vm6 = vcmask 1046534   ;;  %vm691_vm7 = vcmask 1045508  }
   0xb   :  { %v45_v16 = vld [vmem:[%s1080_s0] sm:$0xff]  ;;  %v46_v18 = vld [vmem:[%s1080_s0 + $0x8] sm:$0xff]  ;;  %s703_s10 = sshll.u32 %s1087_s7, 4  ;;  %s704_s10 = int_to_ptr.hbm [resolvable:$true] %s703_s10 }
   0xc   :  { %v64_v19 = vperm.slane %v45_v16, 0  ;;  %v65_v20 = vperm.slane %v45_v16, 2  ;;  %v66_v21 = vperm.slane %v45_v16, 4  ;;  %v67_v22 = vperm.slane %v45_v16, 6 }
   0xd   :  { %748 = vset.pattern.permute.xlu0 %v782_v4  ;;  %750 = vset.pattern.permute.xlu1 %v781_v3  ;;  %v124_v23 = vperm.slane %v45_v16, 1  ;;  %v125_v24 = vperm.slane %v45_v16, 3  ;;  %v126_v25 = vperm.slane %v45_v16, 5  ;;  %v127_v26 = vperm.slane %v45_v16, 7 }
   0xe   :  { %59 = vperm.xlu0 %748, %v31_v1   ;;  %117 = vperm.xlu1 %750, %v30_v2   ;;  %v68_v27 = vperm.slane %v46_v18, 0  ;;  %v128_v28 = vperm.slane %v46_v18, 1  ;;  %v129_v29 = vperm.slane %v46_v18, 3  ;;  %v69_v30 = vperm.slane %v46_v18, 2 }
   0xf   :  { %752 = vset.pattern.permute.xlu2 %v781_v3  ;;  %v70_v31 = vperm.slane %v46_v18, 4  ;;  %v130_v32 = vperm.slane %v46_v18, 5  ;;  %v80_v33 = vperm.slane %v64_v19, 0  ;;  %v81_v34 = vperm.slane %v65_v20, 0 }
  0x10   :  { %113 = vperm.xlu2 %752, %v29_v5   ;;  %v82_v35 = vperm.slane %v66_v21, 0  ;;  %v83_v36 = vperm.slane %v67_v22, 0  ;;  %v140_v37 = vperm.slane %v124_v23, 1  ;;  %v141_v38 = vperm.slane %v125_v24, 1 }
  0x11   :  { %v142_v39 = vperm.slane %v126_v25, 1  ;;  %v143_v40 = vperm.slane %v127_v26, 1  ;;  %v869_v41 = vperm.slane %v68_v27, 0  ;;  %v871_v42 = vperm.slane %v128_v28, 1 }
  0x12   :  { %v873_v43 = vperm.slane %v129_v29, 1  ;;  %v71_v44 = vperm.slane %v46_v18, 6  ;;  %v85_v47 = vperm.slane %v69_v30, 0  ;;  %v877_v48 = vperm.slane %v70_v31, 0 }
  0x13   :  { %v879_v49 = vperm.slane %v130_v32, 1  ;;  %v131_v50 = vperm.slane %v46_v18, 7 }
  0x14   :  { %v87_v0 = vperm.slane %v71_v44, 0 }
  0x15   :  { %v884_v1 = vperm.slane %v131_v50, 1 }
  0x16   :  { %198 = vperm.xlu0 %748, %v32_v6   ;;  %753 = vset.pattern.permute.xlu1 %v782_v4 }
  0x17   :  { %208 = vperm.xlu1 %753, %v34_v7  }
  0x18   :  { %754 = vset.pattern.permute.xlu2 %v782_v4 }
  0x19   :  { %203 = vperm.xlu2 %754, %v33_v8  }
  0x1e   :  { %548 = vperm.xlu0 %748, %v42_v9  }
  0x1f   :  { %261 = vperm.xlu1 %753, %v38_v10  }
  0x21   :  { %266 = vperm.xlu2 %754, %v39_v11  }
  0x27   :  { %271 = vperm.xlu1 %753, %v40_v12  }
  0x29   :  { %543 = vperm.xlu2 %754, %v41_v13  }
  0x2f   :  { %553 = vperm.xlu1 %753, %v43_v14  }
  0x31   :  { %654 = vperm.xlu2 %754, %v44_v15  }
  0x61   :  { %v50_v17 = vpop.permute.xlu2 %49 }
  0x62   :  { %v88_v52 = vmul.f32 %v80_v33, %v50_v17  ;;  %v89_v53 = vmul.f32 %v81_v34, %v50_v17  ;;  %v90_v54 = vmul.f32 %v82_v35, %v50_v17  ;;  %v91_v55 = vmul.f32 %v83_v36, %v50_v17 }
  0x63   :  { %v92_v58 = vmul.f32 %v869_v41, %v50_v17  ;;  %v93_v59 = vmul.f32 %v85_v47, %v50_v17  ;;  %v887_v2 = vmul.f32 %v877_v48, %v50_v17  ;;  %v894_v6 = vmul.f32 %v87_v0, %v50_v17 }
  0x6a   :  { %v114_v51 = vpop.permute.xlu2 %113 }
  0x6b   :  { %v148_v56 = vmul.f32 %v140_v37, %v114_v51  ;;  %v149_v57 = vmul.f32 %v141_v38, %v114_v51  ;;  %v150_v60 = vmul.f32 %v142_v39, %v114_v51  ;;  %v151_v61 = vmul.f32 %v143_v40, %v114_v51 }
  0x6c   :  { %v152_v62 = vmul.f32 %v871_v42, %v114_v51  ;;  %v153_v63 = vmul.f32 %v873_v43, %v114_v51  ;;  %v892_v5 = vmul.f32 %v879_v49, %v114_v51  ;;  %v905_v14 = vmul.f32 %v884_v1, %v114_v51 }
  0x6d   :  { %v172_v3 = vadd.f32 %v148_v56, %v88_v52  ;;  %v889_v4 = vadd.f32 %v149_v57, %v89_v53  ;;  %v896_v7 = vadd.f32 %v150_v60, %v90_v54  ;;  %v898_v8 = vadd.f32 %v151_v61, %v91_v55 }
  0x6e   :  { %v900_v9 = vadd.f32 %v152_v62, %v92_v58  ;;  %v902_v10 = vadd.f32 %v153_v63, %v93_v59 }
  0x77   :  { %v875_v45 = vpop.permute.xlu1 %54  ;;  %v122_v46 = vpop.permute.xlu0 %121 }
  0x78   :  { %v164_v11 = vmul.f32 %v140_v37, %v122_v46  ;;  %v165_v12 = vmul.f32 %v141_v38, %v122_v46  ;;  %v166_v13 = vmul.f32 %v142_v39, %v122_v46  ;;  %v167_v18 = vmul.f32 %v143_v40, %v122_v46 }
  0x79   :  { %v96_v17 = vmul.f32 %v80_v33, %v875_v45  ;;  %v97_v19 = vmul.f32 %v81_v34, %v875_v45  ;;  %v98_v20 = vmul.f32 %v82_v35, %v875_v45  ;;  %v99_v22 = vmul.f32 %v83_v36, %v875_v45 }
  0x7a   :  { %v168_v23 = vmul.f32 %v871_v42, %v122_v46  ;;  %v169_v24 = vmul.f32 %v873_v43, %v122_v46  ;;  %v170_v31 = vmul.f32 %v879_v49, %v122_v46  ;;  %v171_v32 = vmul.f32 %v884_v1, %v122_v46 }
  0x80   :  { %v60_v15 = vpop.permute.xlu0 %59  ;;  %v907_v16 = vpop.permute.xlu1 %117 }
  0x81   :  { %v104_v21 = vmul.f32 %v80_v33, %v60_v15  ;;  %v156_v25 = vmul.f32 %v140_v37, %v907_v16  ;;  %v157_v26 = vmul.f32 %v141_v38, %v907_v16  ;;  %v158_v27 = vmul.f32 %v142_v39, %v907_v16  ;;  %v924_v39 = vpop.permute.xlu2 %203 }
  0x82   :  { %v159_v28 = vmul.f32 %v143_v40, %v907_v16  ;;  %v105_v29 = vmul.f32 %v81_v34, %v60_v15  ;;  %v106_v30 = vmul.f32 %v82_v35, %v60_v15  ;;  %v107_v33 = vmul.f32 %v83_v36, %v60_v15 }
  0x83   :  { %v180_v44 = vadd.f32 %v156_v25, %v96_v17  ;;  %v181_v50 = vadd.f32 %v157_v26, %v97_v19  ;;  %v182_v51 = vadd.f32 %v158_v27, %v98_v20  ;;  %v108_v37 = vmul.f32 %v869_v41, %v60_v15 }
  0x84   :  { %v183_v52 = vadd.f32 %v159_v28, %v99_v22  ;;  %v109_v53 = vmul.f32 %v85_v47, %v60_v15  ;;  %v100_v38 = vmul.f32 %v869_v41, %v875_v45  ;;  %v188_v40 = vadd.f32 %v164_v11, %v104_v21 }
  0x85   :  { %v101_v34 = vmul.f32 %v85_v47, %v875_v45  ;;  %v102_v35 = vmul.f32 %v877_v48, %v875_v45  ;;  %v103_v36 = vmul.f32 %v87_v0, %v875_v45  ;;  %v189_v46 = vadd.f32 %v165_v12, %v105_v29 }
  0x86   :  { %v219_v54 = vadd.f32 %v924_v39, %v180_v44  ;;  %v110_v55 = vmul.f32 %v877_v48, %v60_v15  ;;  %v111_v56 = vmul.f32 %v87_v0, %v60_v15  ;;  %v190_v58 = vadd.f32 %v166_v13, %v106_v30  ;;  %v35_v44 = vld [vmem:[%s1083_s3] sm:$0xff] }
  0x87   :  { %v191_v41 = vadd.f32 %v167_v18, %v107_v33  ;;  %v220_v59 = vadd.f32 %v924_v39, %v181_v50  ;;  %v221_v60 = vadd.f32 %v924_v39, %v182_v51  ;;  %v222_v61 = vadd.f32 %v924_v39, %v183_v52 }
  0x88   :  { %v932_v57 = vpop.permute.xlu0 %198  ;;  %v192_v45 = vadd.f32 %v168_v23, %v108_v37  ;;  %v193_v63 = vadd.f32 %v169_v24, %v109_v53  ;;  %v243_v15 = vmax.f32 %v219_v54, 0.0  ;;  %v194_v18 = vadd.f32 %v170_v31, %v110_v55 }
  0x89   :  { %v209_v47 = vpop.permute.xlu1 %208  ;;  %v211_v62 = vadd.f32 %v932_v57, %v172_v3  ;;  %v212_v13 = vadd.f32 %v932_v57, %v889_v4  ;;  %v195_v17 = vadd.f32 %v171_v32, %v111_v56  ;;  %v213_v22 = vadd.f32 %v932_v57, %v896_v7 }
  0x8a   :  { %v227_v11 = vadd.f32 %v209_v47, %v188_v40  ;;  %v228_v12 = vadd.f32 %v209_v47, %v189_v46  ;;  %v229_v48 = vadd.f32 %v209_v47, %v190_v58  ;;  %v230_v0 = vadd.f32 %v209_v47, %v191_v41  ;;  %v36_v41 = vld [vmem:[%s1083_s3 + $0x8] sm:$0xff] }
  0x8b   :  { %v244_v25 = vmax.f32 %v220_v59, 0.0  ;;  %v245_v23 = vmax.f32 %v221_v60, 0.0  ;;  %v214_v24 = vadd.f32 %v932_v57, %v898_v8  ;;  %v246_v26 = vmax.f32 %v222_v61, 0.0  ;;  %v37_v59 = vld [vmem:[%s1083_s3 + $0x10] sm:$0xf]  ;;  %s783_s3 = smov [#allocation3]  }
  0x8c   :  { %v251_v19 = vmax.f32 %v227_v11, 0.0  ;;  %v252_v20 = vmax.f32 %v228_v12, 0.0  ;;  %v253_v21 = vmax.f32 %v229_v48, 0.0  ;;  %v254_v3 = vmax.f32 %v230_v0, 0.0  ;;  %s701_s8 = sshll.u32 %s783_s3, 4  ;;  %s702_s8 = int_to_ptr.vmem [resolvable:$true] %s701_s8 }
  0x8d   :  { %v235_v4 = vmax.f32 %v211_v62, 0.0  ;;  %v160_v27 = vmul.f32 %v871_v42, %v907_v16  ;;  %v161_v28 = vmul.f32 %v873_v43, %v907_v16  ;;  %v236_v7 = vmax.f32 %v212_v13, 0.0 }
  0x8e   :  { %712 = vmatpush.msk.msra.mxu0 %vm284_vm0, %v251_v19  ;;  %716 = vmatpush.msk.msra.mxu1 %vm284_vm0, %v252_v20  ;;  %v231_v29 = vadd.f32 %v209_v47, %v192_v45  ;;  %v232_v30 = vadd.f32 %v209_v47, %v193_v63  ;;  %v162_v8 = vmul.f32 %v879_v49, %v907_v16  ;;  %v237_v31 = vmax.f32 %v213_v22, 0.0 }
  0x8f   :  { %720 = vmatpush.msk.msra.mxu2 %vm284_vm0, %v253_v21  ;;  %724 = vmatpush.msk.msra.mxu3 %vm284_vm0, %v254_v3  ;;  %v184_v32 = vadd.f32 %v160_v27, %v100_v38  ;;  %v185_v33 = vadd.f32 %v161_v28, %v101_v34  ;;  %v163_v42 = vmul.f32 %v884_v1, %v907_v16  ;;  %v238_v43 = vmax.f32 %v214_v24, 0.0 }
  0x90   :  { %323 = vmatpush.msra.mxu0 %v243_v15  ;;  %349 = vmatpush.msra.mxu1 %v244_v25  ;;  %v233_v50 = vadd.f32 %v209_v47, %v194_v18  ;;  %v234_v51 = vadd.f32 %v209_v47, %v195_v17  ;;  %v186_v52 = vadd.f32 %v162_v8, %v102_v35  ;;  %v255_v1 = vmax.f32 %v231_v29, 0.0  ;;  %v1011_v18 = vpop.permute.xlu2 %266 }
  0x91   :  { %375 = vmatpush.msra.mxu2 %v245_v23  ;;  %401 = vmatpush.msra.mxu3 %v246_v26  ;;  %v223_v49 = vadd.f32 %v924_v39, %v184_v32  ;;  %v224_v37 = vadd.f32 %v924_v39, %v185_v33  ;;  %v187_v53 = vadd.f32 %v163_v42, %v103_v36  ;;  %v256_v34 = vmax.f32 %v232_v30, 0.0  ;;  %v1007_v61 = vpop.permute.xlu1 %261 }
  0x92   :  { %324 = vmatpush.msra.mxu0 %v235_v4  ;;  %350 = vmatpush.msra.mxu1 %v236_v7  ;;  %v225_v16 = vadd.f32 %v924_v39, %v186_v52  ;;  %v178_v38 = vadd.f32 %v892_v5, %v887_v2  ;;  %v179_v40 = vadd.f32 %v905_v14, %v894_v6  ;;  %v257_v2 = vmax.f32 %v233_v50, 0.0 }
  0x93   :  { %376 = vmatpush.msra.mxu2 %v237_v31  ;;  %402 = vmatpush.msra.mxu3 %v238_v43  ;;  %v226_v35 = vadd.f32 %v924_v39, %v187_v53  ;;  %v215_v36 = vadd.f32 %v932_v57, %v900_v9  ;;  %v216_v46 = vadd.f32 %v932_v57, %v902_v10  ;;  %v258_v5 = vmax.f32 %v234_v51, 0.0  ;;  %v1024_v31 = vpop.permute.xlu0 %548 }
  0x94   :  { %713 = vmatmul.msk.f32.vlgmr.msra.gmra.mxu0 %vm274_vm1, %v35_v44  ;;  %717 = vmatmul.msk.f32.vlgmr.msra.gmra.mxu1 %vm274_vm1, %v35_v44  ;;  %v217_v6 = vadd.f32 %v932_v57, %v178_v38  ;;  %v218_v14 = vadd.f32 %v932_v57, %v179_v40  ;;  %v247_v39 = vmax.f32 %v223_v49, 0.0  ;;  %v248_v54 = vmax.f32 %v224_v37, 0.0 }
  0x95   :  { %721 = vmatmul.msk.f32.vlgmr.msra.gmra.mxu2 %vm274_vm1, %v35_v44  ;;  %725 = vmatmul.msk.f32.vlgmr.msra.gmra.mxu3 %vm274_vm1, %v35_v44  ;;  %v249_v9 = vmax.f32 %v225_v16, 0.0  ;;  %v250_v10 = vmax.f32 %v226_v35, 0.0  ;;  %v239_v55 = vmax.f32 %v215_v36, 0.0  ;;  %v240_v56 = vmax.f32 %v216_v46, 0.0 }
  0x96   :  { %728 = vmatpush.msk.msrb.mxu0 %vm284_vm0, %v255_v1  ;;  %732 = vmatpush.msk.msrb.mxu1 %vm284_vm0, %v256_v34  ;;  %v241_v58 = vmax.f32 %v217_v6, 0.0  ;;  %v242_v57 = vmax.f32 %v218_v14, 0.0 }
  0x97   :  { %736 = vmatpush.msk.msrb.mxu2 %vm284_vm0, %v257_v2  ;;  %740 = vmatpush.msk.msrb.mxu3 %vm284_vm0, %v258_v5 }
  0x98   :  { %427 = vmatpush.msrb.mxu0 %v247_v39  ;;  %453 = vmatpush.msrb.mxu1 %v248_v54  ;;  %v1030_v49 = vpop.permute.xlu2 %543 }
  0x99   :  { %479 = vmatpush.msrb.mxu2 %v249_v9  ;;  %505 = vmatpush.msrb.mxu3 %v250_v10  ;;  %v1009_v12 = vpop.permute.xlu1 %271 }
  0x9a   :  { %428 = vmatpush.msrb.mxu0 %v239_v55  ;;  %454 = vmatpush.msrb.mxu1 %v240_v56 }
  0x9b   :  { %480 = vmatpush.msrb.mxu2 %v241_v58  ;;  %506 = vmatpush.msrb.mxu3 %v242_v57 }
  0x9c   :  { %714 = vmatmul.msk.f32.gmra.mxu0 %vm274_vm1, %v36_v41  ;;  %718 = vmatmul.msk.f32.gmra.mxu1 %vm274_vm1, %v36_v41 }
  0x9d   :  { %722 = vmatmul.msk.f32.gmra.mxu2 %vm274_vm1, %v36_v41  ;;  %726 = vmatmul.msk.f32.gmra.mxu3 %vm274_vm1, %v36_v41 }
  0xa1   :  { %v1018_v25 = vpop.permute.xlu1 %553 }
  0xa4   :  { %715 = vmatmul.msk.f32.gmra.mxu0 %vm274_vm1, %v37_v59  ;;  %719 = vmatmul.msk.f32.gmra.mxu1 %vm274_vm1, %v37_v59 }
  0xa5   :  { %723 = vmatmul.msk.f32.gmra.mxu2 %vm274_vm1, %v37_v59  ;;  %727 = vmatmul.msk.f32.gmra.mxu3 %vm274_vm1, %v37_v59 }
  0xac   :  { %729 = vmatmul.msk.f32.vlgmr.msrb.gmra.mxu0 %vm274_vm1, %v35_v44  ;;  %733 = vmatmul.msk.f32.vlgmr.msrb.gmra.mxu1 %vm274_vm1, %v35_v44 }
  0xad   :  { %737 = vmatmul.msk.f32.vlgmr.msrb.gmra.mxu2 %vm274_vm1, %v35_v44  ;;  %741 = vmatmul.msk.f32.vlgmr.msrb.gmra.mxu3 %vm274_vm1, %v35_v44 }
  0xb4   :  { %730 = vmatmul.msk.f32.gmra.mxu0 %vm274_vm1, %v36_v41  ;;  %734 = vmatmul.msk.f32.gmra.mxu1 %vm274_vm1, %v36_v41 }
  0xb5   :  { %738 = vmatmul.msk.f32.gmra.mxu2 %vm274_vm1, %v36_v41  ;;  %742 = vmatmul.msk.f32.gmra.mxu3 %vm274_vm1, %v36_v41 }
  0xbc   :  { %731 = vmatmul.msk.f32.gmra.mxu0 %vm274_vm1, %v37_v59  ;;  %735 = vmatmul.msk.f32.gmra.mxu1 %vm274_vm1, %v37_v59 }
  0xbd   :  { %739 = vmatmul.msk.f32.gmra.mxu2 %vm274_vm1, %v37_v59  ;;  %743 = vmatmul.msk.f32.gmra.mxu3 %vm274_vm1, %v37_v59 }
 0x111   :  { %v326_v60 = vpop.f32.mrf.mxu0  ;;  %v352_v47 = vpop.f32.mrf.mxu1 }
 0x112   :  { %v353_v20 = vadd.f32 %v352_v47, %v1007_v61  ;;  %v327_v1 = vadd.f32 %v326_v60, %v1007_v61 }
 0x114   :  { %v518_v28 = vmax.f32 %v353_v20, 0.0  ;;  %v517_v9 = vmax.f32 %v327_v1, 0.0 }
 0x116   :  { %v557_v16 = vmul.f32 %v1030_v49, %v518_v28 }
 0x118   :  { %v378_v62 = vpop.f32.mrf.mxu2  ;;  %v404_v45 = vpop.f32.mrf.mxu3 }
 0x119   :  { %v329_v63 = vpop.f32.mrf.mxu0  ;;  %v355_v11 = vpop.f32.mrf.mxu1  ;;  %v379_v24 = vadd.f32 %v378_v62, %v1007_v61  ;;  %v405_v26 = vadd.f32 %v404_v45, %v1007_v61 }
 0x11a   :  { %v356_v19 = vadd.f32 %v355_v11, %v1011_v18  ;;  %v330_v44 = vadd.f32 %v329_v63, %v1011_v18 }
 0x11b   :  { %v519_v37 = vmax.f32 %v379_v24, 0.0  ;;  %v520_v53 = vmax.f32 %v405_v26, 0.0 }
 0x11c   :  { %v526_v23 = vmax.f32 %v356_v19, 0.0  ;;  %v525_v2 = vmax.f32 %v330_v44, 0.0 }
 0x11d   :  { %v558_v6 = vmul.f32 %v1030_v49, %v519_v37  ;;  %v559_v14 = vmul.f32 %v1030_v49, %v520_v53 }
 0x11e   :  { %v565_v50 = vmul.f32 %v1024_v31, %v526_v23  ;;  %v564_v47 = vmul.f32 %v1024_v31, %v525_v2 }
 0x120   :  { %v381_v48 = vpop.f32.mrf.mxu2  ;;  %v407_v0 = vpop.f32.mrf.mxu3  ;;  %v589_v5 = vadd.f32 %v565_v50, %v557_v16 }
 0x121   :  { %v332_v15 = vpop.f32.mrf.mxu0  ;;  %v358_v13 = vpop.f32.mrf.mxu1  ;;  %v382_v21 = vadd.f32 %v381_v48, %v1011_v18  ;;  %v408_v22 = vadd.f32 %v407_v0, %v1011_v18  ;;  %v556_v48 = vmul.f32 %v1030_v49, %v517_v9 }
 0x122   :  { %v359_v17 = vadd.f32 %v358_v13, %v1009_v12  ;;  %v333_v42 = vadd.f32 %v332_v15, %v1009_v12 }
 0x123   :  { %v527_v32 = vmax.f32 %v382_v21, 0.0  ;;  %v528_v33 = vmax.f32 %v408_v22, 0.0  ;;  %v580_v19 = vadd.f32 %v564_v47, %v556_v48 }
 0x124   :  { %v534_v3 = vmax.f32 %v359_v17, 0.0  ;;  %v533_v36 = vmax.f32 %v333_v42, 0.0 }
 0x125   :  { %v566_v34 = vmul.f32 %v1024_v31, %v527_v32  ;;  %v567_v35 = vmul.f32 %v1024_v31, %v528_v33 }
 0x126   :  { %v573_v43 = vmul.f32 %v1018_v25, %v534_v3  ;;  %v572_v60 = vmul.f32 %v1018_v25, %v533_v36 }
 0x127   :  { %v598_v41 = vadd.f32 %v566_v34, %v558_v6  ;;  %v607_v59 = vadd.f32 %v567_v35, %v559_v14 }
 0x128   :  { %v384_v4 = vpop.f32.mrf.mxu2  ;;  %v410_v27 = vpop.f32.mrf.mxu3  ;;  %v590_v46 = vsel %vm284_vm0, %v573_v43, 0.0  ;;  %v581_v17 = vsel %vm284_vm0, %v572_v60, 0.0 }
 0x129   :  { %v385_v7 = vadd.f32 %v384_v4, %v1009_v12  ;;  %v411_v29 = vadd.f32 %v410_v27, %v1009_v12  ;;  %v430_v30 = vpop.f32.mrf.mxu0  ;;  %v456_v8 = vpop.f32.mrf.mxu1  ;;  %v591_v10 = vadd.f32 %v590_v46, %v589_v5  ;;  %v582_v26 = vadd.f32 %v581_v17, %v580_v19 }
 0x12a   :  { %v431_v15 = vadd.f32 %v430_v30, %v1007_v61  ;;  %v457_v13 = vadd.f32 %v456_v8, %v1007_v61 }
 0x12b   :  { %v535_v51 = vmax.f32 %v385_v7, 0.0  ;;  %v536_v52 = vmax.f32 %v411_v29, 0.0  ;;  %v592_v0 = vrot.slane %v591_v10, 4  ;;  %v583_v1 = vrot.slane %v582_v26, 4 }
 0x12c   :  { %v521_v27 = vmax.f32 %v431_v15, 0.0  ;;  %v522_v28 = vmax.f32 %v457_v13, 0.0 }
 0x12d   :  { %v574_v38 = vmul.f32 %v1018_v25, %v535_v51  ;;  %v575_v40 = vmul.f32 %v1018_v25, %v536_v52  ;;  %v593_v4 = vadd.f32 %v592_v0, %v591_v10 }
 0x12f   :  { %v599_v55 = vsel %vm284_vm0, %v574_v38, 0.0  ;;  %v608_v56 = vsel %vm284_vm0, %v575_v40, 0.0  ;;  %v594_v16 = vrot.slane %v593_v4, 2  ;;  %v561_v38 = vmul.f32 %v1030_v49, %v522_v28 }
 0x130   :  { %v482_v39 = vpop.f32.mrf.mxu2  ;;  %v508_v54 = vpop.f32.mrf.mxu3  ;;  %v600_v63 = vadd.f32 %v599_v55, %v598_v41  ;;  %v609_v11 = vadd.f32 %v608_v56, %v607_v59  ;;  %v584_v41 = vadd.f32 %v583_v1, %v582_v26 }
 0x131   :  { %v433_v58 = vpop.f32.mrf.mxu0  ;;  %v459_v57 = vpop.f32.mrf.mxu1  ;;  %v483_v42 = vadd.f32 %v482_v39, %v1007_v61  ;;  %v509_v43 = vadd.f32 %v508_v54, %v1007_v61  ;;  %v595_v59 = vadd.f32 %v594_v16, %v593_v4 }
 0x132   :  { %v434_v62 = vadd.f32 %v433_v58, %v1011_v18  ;;  %v460_v45 = vadd.f32 %v459_v57, %v1011_v18  ;;  %v601_v22 = vrot.slane %v600_v63, 4  ;;  %v610_v3 = vrot.slane %v609_v11, 4 }
 0x133   :  { %v523_v36 = vmax.f32 %v483_v42, 0.0  ;;  %v524_v46 = vmax.f32 %v509_v43, 0.0 }
 0x134   :  { %v529_v20 = vmax.f32 %v434_v62, 0.0  ;;  %v530_v21 = vmax.f32 %v460_v45, 0.0  ;;  %v602_v51 = vadd.f32 %v601_v22, %v600_v63  ;;  %v611_v52 = vadd.f32 %v610_v3, %v609_v11 }
 0x135   :  { %v562_v15 = vmul.f32 %v1030_v49, %v523_v36  ;;  %v563_v13 = vmul.f32 %v1030_v49, %v524_v46 }
 0x136   :  { %v568_v44 = vmul.f32 %v1024_v31, %v529_v20  ;;  %v569_v50 = vmul.f32 %v1024_v31, %v530_v21  ;;  %v603_v6 = vrot.slane %v602_v51, 2  ;;  %v612_v14 = vrot.slane %v611_v52, 2 }
 0x137   :  { %v585_v21 = vrot.slane %v584_v41, 2 }
 0x138   :  { %v485_v23 = vpop.f32.mrf.mxu2  ;;  %v511_v24 = vpop.f32.mrf.mxu3  ;;  %v625_v5 = vadd.f32 %v569_v50, %v561_v38  ;;  %v604_v48 = vadd.f32 %v603_v6, %v602_v51  ;;  %v613_v0 = vadd.f32 %v612_v14, %v611_v52 }
 0x139   :  { %v436_v7 = vpop.f32.mrf.mxu0  ;;  %v462_v29 = vpop.f32.mrf.mxu1  ;;  %v486_v32 = vadd.f32 %v485_v23, %v1011_v18  ;;  %v512_v30 = vadd.f32 %v511_v24, %v1011_v18  ;;  %v560_v18 = vmul.f32 %v1030_v49, %v521_v27  ;;  %v596_v49 = vrot.slane %v595_v59, 1 }
 0x13a   :  { %v437_v8 = vadd.f32 %v436_v7, %v1009_v12  ;;  %v463_v33 = vadd.f32 %v462_v29, %v1009_v12  ;;  %v605_v4 = vrot.slane %v604_v48, 1  ;;  %v614_v27 = vrot.slane %v613_v0, 1 }
 0x13b   :  { %v531_v40 = vmax.f32 %v486_v32, 0.0  ;;  %v532_v34 = vmax.f32 %v512_v30, 0.0  ;;  %v616_v2 = vadd.f32 %v568_v44, %v560_v18  ;;  %v655_v30 = vpop.permute.xlu2 %654 }
 0x13c   :  { %v537_v37 = vmax.f32 %v437_v8, 0.0  ;;  %v538_v53 = vmax.f32 %v463_v33, 0.0  ;;  %v606_v44 = vadd.f32 %v605_v4, %v604_v48  ;;  %v615_v50 = vadd.f32 %v614_v27, %v613_v0 }
 0x13d   :  { %v570_v60 = vmul.f32 %v1024_v31, %v531_v40  ;;  %v571_v47 = vmul.f32 %v1024_v31, %v532_v34 }
 0x13e   :  { %v576_v35 = vmul.f32 %v1018_v25, %v537_v37  ;;  %v577_v61 = vmul.f32 %v1018_v25, %v538_v53  ;;  %v657_v37 = vperm.slane %v655_v30, 0  ;;  %v597_v53 = vadd.f32 %v596_v49, %v595_v59 }
 0x13f   :  { %v634_v22 = vadd.f32 %v570_v60, %v562_v15  ;;  %v643_v3 = vadd.f32 %v571_v47, %v563_v13 }
 0x140   :  { %v617_v39 = vsel %vm284_vm0, %v576_v35, 0.0  ;;  %v626_v54 = vsel %vm284_vm0, %v577_v61, 0.0  ;;  %v488_v9 = vpop.f32.mrf.mxu2  ;;  %v514_v10 = vpop.f32.mrf.mxu3  ;;  %v660_v61 = vadd.f32 %v657_v37, %v606_v44  ;;  %v661_v36 = vadd.f32 %v657_v37, %v615_v50 }
 0x141   :  { %v618_v55 = vadd.f32 %v617_v39, %v616_v2  ;;  %v627_v56 = vadd.f32 %v626_v54, %v625_v5  ;;  %v489_v58 = vadd.f32 %v488_v9, %v1009_v12  ;;  %v515_v57 = vadd.f32 %v514_v10, %v1009_v12 }
 0x142   :  { %v659_v46 = vadd.f32 %v657_v37, %v597_v53  ;;  %v675_v10 = vrot.slane %v660_v61, 6 }
 0x143   :  { %v619_v62 = vrot.slane %v618_v55, 4  ;;  %v628_v45 = vrot.slane %v627_v56, 4  ;;  %v539_v63 = vmax.f32 %v489_v58, 0.0  ;;  %v540_v11 = vmax.f32 %v515_v57, 0.0 }
 0x145   :  { %v620_v17 = vadd.f32 %v619_v62, %v618_v55  ;;  %v629_v19 = vadd.f32 %v628_v45, %v627_v56  ;;  %v578_v12 = vmul.f32 %v1018_v25, %v539_v63  ;;  %v579_v20 = vmul.f32 %v1018_v25, %v540_v11 }
 0x146   :  { %v586_v25 = vadd.f32 %v585_v21, %v584_v41  ;;  %v676_v55 = vrot.slane %v661_v36, 5  ;;  %v674_v56 = vrot.slane %v659_v46, 7 }
 0x147   :  { %v621_v31 = vrot.slane %v620_v17, 2  ;;  %v630_v23 = vrot.slane %v629_v19, 2  ;;  %v635_v24 = vsel %vm284_vm0, %v578_v12, 0.0  ;;  %v644_v26 = vsel %vm284_vm0, %v579_v20, 0.0 }
 0x148   :  { %v636_v28 = vadd.f32 %v635_v24, %v634_v22  ;;  %v645_v7 = vadd.f32 %v644_v26, %v643_v3  ;;  %v587_v40 = vrot.slane %v586_v25, 1  ;;  %v684_v45 = vsel %vm683_vm3, %v675_v10, %v676_v55 }
 0x149   :  { %v622_v29 = vadd.f32 %v621_v31, %v620_v17  ;;  %v631_v32 = vadd.f32 %v630_v23, %v629_v19 }
 0x14a   :  { %v637_v8 = vrot.slane %v636_v28, 4  ;;  %v646_v33 = vrot.slane %v645_v7, 4  ;;  %v588_v39 = vadd.f32 %v587_v40, %v586_v25 }
 0x14b   :  { %v623_v42 = vrot.slane %v622_v29, 1  ;;  %v632_v43 = vrot.slane %v631_v32, 1 }
 0x14c   :  { %v638_v51 = vadd.f32 %v637_v8, %v636_v28  ;;  %v647_v52 = vadd.f32 %v646_v33, %v645_v7  ;;  %v658_v60 = vadd.f32 %v657_v37, %v588_v39 }
 0x14d   :  { %v624_v1 = vadd.f32 %v623_v42, %v622_v29  ;;  %v633_v16 = vadd.f32 %v632_v43, %v631_v32 }
 0x14e   :  { %v639_v18 = vrot.slane %v638_v51, 2  ;;  %v648_v38 = vrot.slane %v647_v52, 2  ;;  %v682_v63 = vsel %vm681_vm2, %v658_v60, %v674_v56 }
 0x14f   :  { %v662_v6 = vadd.f32 %v657_v37, %v624_v1  ;;  %v663_v14 = vadd.f32 %v657_v37, %v633_v16  ;;  %v686_v0 = vsel %vm685_vm4, %v682_v63, %v684_v45 }
 0x150   :  { %v640_v34 = vadd.f32 %v639_v18, %v638_v51  ;;  %v649_v35 = vadd.f32 %v648_v38, %v647_v52 }
 0x151   :  { %v677_v41 = vrot.slane %v662_v6, 4  ;;  %v678_v59 = vrot.slane %v663_v14, 3 }
 0x152   :  { %v641_v2 = vrot.slane %v640_v34, 1  ;;  %v650_v5 = vrot.slane %v649_v35, 1 }
 0x153   :  { %v688_v11 = vsel %vm687_vm5, %v677_v41, %v678_v59 }
 0x154   :  { %v642_v54 = vadd.f32 %v641_v2, %v640_v34  ;;  %v651_v9 = vadd.f32 %v650_v5, %v649_v35 }
 0x156   :  { %v664_v58 = vadd.f32 %v657_v37, %v642_v54  ;;  %v665_v57 = vadd.f32 %v657_v37, %v651_v9 }
 0x158   :  { %v679_v47 = vrot.slane %v664_v58, 2  ;;  %v680_v62 = vrot.slane %v665_v57, 1 }
 0x15a   :  { %v690_v48 = vsel %vm689_vm6, %v679_v47, %v680_v62 }
 0x15b   :  { %v692_v15 = vsel %vm691_vm7, %v688_v11, %v690_v48 }
 0x15c   :  { %v693_v13 = vsel %vm284_vm0, %v686_v0, %v692_v15 }
 0x15d   :  { %695 = vst [vmem:[#allocation3] sm:$0xff] %v693_v13 }
 0x15e   :  { %706 = dma.vmem_to_hbm [thread:$0]  %s702_s8, 128, %s704_s10, [#allocation4]  }
 0x15f   :  { %779 = dma.done.wait [#allocation4], 128  }
 0x160   :  { %780 = vsyncadd [#allocation4], 4294967168 }
 0x161   :  { %711 = vsyncpa [#allocation4], 1 }

</bundles_post_ra>
